<compile_context>
chip_gen: v7x
topology: tpu7x:2x2x1
jax: 0.10.0
libtpu: 0.0.40
codegen_flags: <defaults>
</compile_context>

<pallas_src>
import math

import jax
import jax.numpy as jnp
from jax.experimental import pallas as pl
from jax.experimental.pallas import tpu as pltpu


def _classifier_kernel(feat_ref, wt_ref, b_ref, o_ref):
    # logits = features_tile @ W^T + b  -> (TILE_N, C), f32 accumulation (MXU).
    logits = jnp.dot(
        feat_ref[...], wt_ref[...], preferred_element_type=jnp.float32
    )
    logits = logits + b_ref[...].astype(jnp.float32)  # (1, C) broadcast

    # Numerically stable log-softmax along the class (lane) axis, in f32.
    m = jnp.max(logits, axis=-1, keepdims=True)
    shifted = logits - m
    lse = jnp.log(jnp.sum(jnp.exp(shifted), axis=-1, keepdims=True))
    o_ref[...] = (shifted - lse).astype(o_ref.dtype)


def _sublane_multiple(dtype) -> int:
    # Native (sublane, lane) tiling: (8,128) f32, (16,128) bf16, (32,128) i8/fp8.
    return max(8, 32 // jnp.dtype(dtype).itemsize)


def _vmem_capacity_bytes() -> int:
    try:
        return int(pltpu.get_tpu_info().vmem_capacity_bytes)
    except Exception:
        return 64 * 1024 * 1024  # conservative fallback (v7x per-core VMEM)


def prepare_classifier_params(weight, bias, compute_dtype=None):
    """Hoist the per-call weight relayout out of the hot path.

    weight: (C, H) torch-style nn.Linear weight, bias: (C,).
    Returns (wt, b2): wt is the lane-dense (H, C) RHS, b2 the (1, C) f32 row.
    """
    C, H = weight.shape
    if compute_dtype is None:
        compute_dtype = weight.dtype
    wt = jnp.asarray(weight).astype(compute_dtype).T          # (H, C)
    b2 = jnp.asarray(bias).astype(jnp.float32).reshape(1, C)  # (1, C)
    return wt, b2


def classifier_forward_prepared(features, wt, b2, *, tile_n=None):
    """features: (N, H); wt: (H, C); b2: (1, C)  ->  (N, C) log-probs."""
    N, H = features.shape
    Hw, C = wt.shape
    assert Hw == H and b2.shape == (1, C)

    out_dtype = features.dtype
    feat_bytes = jnp.dtype(features.dtype).itemsize
    out_bytes = jnp.dtype(out_dtype).itemsize
    wt_bytes = jnp.dtype(wt.dtype).itemsize
    sub = _sublane_multiple(features.dtype)

    # --- Tile sizing -------------------------------------------------------
    # Largest row tile whose double-buffered feature stream + resident
    # weight/bias + double-buffered output tile fits half of this chip's
    # VMEM (64 MiB v7x, 128 MiB v5e/v6e), capped at 2048 rows (past the
    # measured HBM-roofline knee; more only adds per-step overhead savings).
    vmem_cap = _vmem_capacity_bytes()
    budget = vmem_cap // 2                       # headroom for compiler scratch
    resident = 2 * H * C * wt_bytes + 2 * max(C, 128) * 4
    per_row = 2 * (H * feat_bytes + C * out_bytes)
    tile_cap = max(sub, ((budget - resident) // per_row) // sub * sub)

    if tile_n is None:
        tile_n = 2048
    tile_n = max(sub, min(int(tile_n), tile_cap))
    tile_n = (tile_n + sub - 1) // sub * sub

    # Never bigger than (sublane-rounded) N ...
    n_rounded = (N + sub - 1) // sub * sub
    tile_n = min(tile_n, n_rounded)
    # ... and keep >= 2 grid steps when possible so v7x's second TensorCore
    # gets work via the "parallel" axis (harmless on single-core v5e/v6e).
    if pl.cdiv(N, tile_n) < 2 and N > sub:
        tile_n = (((N + 1) // 2) + sub - 1) // sub * sub

    n_tiles = pl.cdiv(N, tile_n)

    cost = pl.CostEstimate(
        flops=2 * N * H * C,
        transcendentals=2 * N * C,
        bytes_accessed=(
            N * H * feat_bytes + H * C * wt_bytes + C * 4 + N * C * out_bytes
        ),
    )

    return pl.pallas_call(
        _classifier_kernel,
        out_shape=jax.ShapeDtypeStruct((N, C), out_dtype),
        grid=(n_tiles,),
        in_specs=[
            pl.BlockSpec((tile_n, H), lambda i: (i, 0)),  # streamed, double-buffered
            pl.BlockSpec((H, C), lambda i: (0, 0)),       # VMEM-resident (DMA'd once)
            pl.BlockSpec((1, C), lambda i: (0, 0)),       # VMEM-resident (DMA'd once)
        ],
        out_specs=pl.BlockSpec((tile_n, C), lambda i: (i, 0)),
        compiler_params=pltpu.CompilerParams(
            dimension_semantics=("parallel",),
            vmem_limit_bytes=int(budget),
        ),
        cost_estimate=cost,
    )(features, wt, b2)


def classifier_forward(features, weight, bias, *, tile_n=None, compute_dtype=None):
    """Convenience wrapper. features: (N, H), weight: (C, H), bias: (C,).

    compute_dtype=jnp.bfloat16 halves the HBM feature-stream bytes (the
    matmul accumulation and log-softmax stay f32); default keeps f32 to match
    the PyTorch module exactly.
    """
    if compute_dtype is None:
        compute_dtype = features.dtype
    wt, b2 = prepare_classifier_params(weight, bias, compute_dtype)
    feats = jnp.asarray(features).astype(compute_dtype)
    return classifier_forward_prepared(feats, wt, b2, tile_n=tile_n)


def init_classifier_params(key, n_hidden, n_classes, dtype=jnp.float32):
    """Matches the PyTorch init: xavier_uniform_ weight, zero bias."""
    bound = math.sqrt(6.0 / (n_hidden + n_classes))
    weight = jax.random.uniform(
        key, (n_classes, n_hidden), dtype=dtype, minval=-bound, maxval=bound
    )
    bias = jnp.zeros((n_classes,), dtype=dtype)
    return weight, bias


if __name__ == "__main__":
    N = 50   # number of nodes/rows (ragged: not a multiple of the row tile)
    H = 32   # n_hidden
    C = 8    # n_classes

    key = jax.random.PRNGKey(0)
    k_w, k_f = jax.random.split(key, 2)

    weight, bias = init_classifier_params(k_w, H, C)
    features = jax.random.normal(k_f, (N, H), dtype=jnp.float32)

    # Hot path: params prepared once, then the forward pass.  For this small
    # N the auto tile is split in two (32 + ragged 18) so the masked last
    # block and the 2-step "parallel" grid are both exercised.
    wt, b2 = prepare_classifier_params(weight, bias, jnp.float32)
    out = jax.block_until_ready(classifier_forward_prepared(features, wt, b2))

    # Pure-JAX reference mirroring torch: log_softmax(features @ W.T + b, -1)
    ref = jax.nn.log_softmax(features @ weight.T + bias, axis=-1)
    assert out.shape == (N, C)
    assert jnp.allclose(out, ref, atol=1e-5, rtol=1e-5)
    # log-probs must normalize: logsumexp over classes == 0
    assert jnp.allclose(
        jax.scipy.special.logsumexp(out, axis=-1), jnp.zeros((N,)), atol=1e-5
    )

    # Also exercise the convenience wrapper with an explicit tiny tile
    # (multi-step grid + ragged last block).
    out2 = jax.block_until_ready(
        classifier_forward(features, weight, bias, tile_n=16)
    )
    assert jnp.allclose(out2, ref, atol=1e-5, rtol=1e-5)

    print("KERNEL_OK")
</pallas_src>

<mosaic_0001>
module attributes {stable_mosaic.version = 11 : i64} {
  func.func @_classifier_kernel(%arg0: i32, %arg1: memref<32x32xf32, #tpu.memory_space<vmem>>, %arg2: memref<32x8xf32, #tpu.memory_space<vmem>>, %arg3: memref<1x8xf32, #tpu.memory_space<vmem>>, %arg4: memref<32x8xf32, #tpu.memory_space<vmem>>) attributes {dimension_semantics = [#tpu.dimension_semantics<parallel>], iteration_bounds = array<i64: 2>, scalar_prefetch = 0 : i64, scratch_operands = 0 : i64, tpu.core_type = #tpu.core_type<tc>, window_params = [{transform_indices = @transform_0, window_bounds = array<i64: 32, 32>}, {pipeline_mode = #tpu.pipeline_mode<synchronous>, transform_indices = @transform_1, window_bounds = array<i64: 32, 8>}, {pipeline_mode = #tpu.pipeline_mode<synchronous>, transform_indices = @transform_2, window_bounds = array<i64: 1, 8>}, {transform_indices = @transform_3, window_bounds = array<i64: 32, 8>}]} {
    %c0 = arith.constant 0 : index
    %c0_0 = arith.constant 0 : index
    %0 = vector.load %arg1[%c0, %c0_0] : memref<32x32xf32, #tpu.memory_space<vmem>>, vector<32x32xf32>
    %c0_1 = arith.constant 0 : index
    %c0_2 = arith.constant 0 : index
    %1 = vector.load %arg2[%c0_1, %c0_2] : memref<32x8xf32, #tpu.memory_space<vmem>>, vector<32x8xf32>
    %cst = arith.constant dense<0.000000e+00> : vector<32x8xf32>
    %2 = tpu.matmul %0, %1, %cst {dimension_numbers = #tpu.dot_dimension_numbers<[1], [0], [0], [1], [0, 0, 1, 1], [], []>} : vector<32x32xf32>, vector<32x8xf32>, vector<32x8xf32> -> vector<32x8xf32>
    %c0_3 = arith.constant 0 : index
    %c0_4 = arith.constant 0 : index
    %3 = vector.load %arg3[%c0_3, %c0_4] : memref<1x8xf32, #tpu.memory_space<vmem>>, vector<1x8xf32>
    %4 = vector.broadcast %3 : vector<1x8xf32> to vector<32x8xf32>
    %5 = arith.addf %2, %4 : vector<32x8xf32>
    %cst_5 = arith.constant dense<0xFF800000> : vector<32xf32>
    %6 = vector.multi_reduction <maximumf>, %5, %cst_5 [1] : vector<32x8xf32> to vector<32xf32>
    %7 = vector.shape_cast %6 : vector<32xf32> to vector<32x1xf32>
    %8 = vector.broadcast %7 : vector<32x1xf32> to vector<32x8xf32>
    %9 = arith.subf %5, %8 : vector<32x8xf32>
    %10 = math.exp %9 : vector<32x8xf32>
    %cst_6 = arith.constant dense<0.000000e+00> : vector<32xf32>
    %11 = vector.multi_reduction <add>, %10, %cst_6 [1] : vector<32x8xf32> to vector<32xf32>
    %12 = vector.shape_cast %11 : vector<32xf32> to vector<32x1xf32>
    %13 = math.log %12 : vector<32x1xf32>
    %14 = vector.broadcast %13 : vector<32x1xf32> to vector<32x8xf32>
    %15 = arith.subf %9, %14 : vector<32x8xf32>
    %c0_7 = arith.constant 0 : index
    %c0_8 = arith.constant 0 : index
    %16 = vector.load %arg4[%c0_7, %c0_8] : memref<32x8xf32, #tpu.memory_space<vmem>>, vector<32x8xf32>
    tpu.vector_store %arg4[%c0_7, %c0_8], %15 {strides = array<i32>} : memref<32x8xf32, #tpu.memory_space<vmem>>, vector<32x8xf32>,
    return
  }
  func.func @transform_0(%arg0: i32) -> (i32, i32) {
    %c0_i32 = arith.constant 0 : i32
    %c0_i32_0 = arith.constant 0 : i32
    return %arg0, %c0_i32 : i32, i32
  }
  func.func @transform_1(%arg0: i32) -> (i32, i32) {
    %c0_i32 = arith.constant 0 : i32
    %c0_i32_0 = arith.constant 0 : i32
    %c0_i32_1 = arith.constant 0 : i32
    return %c0_i32, %c0_i32_0 : i32, i32
  }
  func.func @transform_2(%arg0: i32) -> (i32, i32) {
    %c0_i32 = arith.constant 0 : i32
    %c0_i32_0 = arith.constant 0 : i32
    %c0_i32_1 = arith.constant 0 : i32
    return %c0_i32, %c0_i32_0 : i32, i32
  }
  func.func @transform_3(%arg0: i32) -> (i32, i32) {
    %c0_i32 = arith.constant 0 : i32
    %c0_i32_0 = arith.constant 0 : i32
    return %arg0, %c0_i32 : i32, i32
  }
}

</mosaic_0001>

<bundles_post_ra>
// kernel: tpu_custom_call.1
= control target key start
LH: loop header
LB: loop body
LE: loop exit
PB: predicated region body
PF: predicated region fallthrough
CT: control target
= control target key end

     0   :  { %s863_s12 = smov 0   ;;  %s865_s13 = smov 0   ;;  %s990_s0 = inlined_call_operand.vmem [shape: f32[50,32], index: 0, kind: input, shape index: {}]   ;;  %s991_s1 = inlined_call_operand.vmem [shape: f32[32,8], index: 1, kind: input, shape index: {}]   ;;  %s992_s2 = inlined_call_operand.vmem [shape: f32[1,8], index: 2, kind: input, shape index: {}]   ;;  %s993_s3 = inlined_call_operand.vmem [shape: f32[50,8], index: 3, kind: output, shape index: {}]  }
   0x1   :  { %s867_s14 = smov 0  }
   0x2 LB: > { %s876_s15 = sadd.s32 4294967295, %s809_s14   ;;  %s878_s16 = sadd.s32 1, %s809_s14   ;;  %s809_s14 = sphi %s867_s14, %s1000_s14   ;;  %s805_s13 = sphi %s865_s13, %s999_s13   ;;  %s801_s12 = sphi %s863_s12, %s998_s12  }
   0x3   : > { %s85_s17 = ssub.s32 %s809_s14, %s878_s16  ;;  %s88_s18 = sadd.s32 1, %s805_s13 }
   0x4   : > { %p86_p0 = scmp.eq.s32.totalorder %s85_s17, 0  ;;  %p98_p1 = scmp.ne.s32.totalorder %s805_s13, %s801_s12 }
   0x5   : > { %p99_p2 = scmp.eq.s32.totalorder %s876_s15, 1  ;;  %p588_p3 = scmp.ge.s32.totalorder %s809_s14, 1 }
   0x6   : > { %s886_s19 = scalar_select %p86_p0, %s805_s13, %s88_s18  }
   0x7   : > { %p888_p4 = por %p99_p2, %p98_p1  ;;  %p146_p5 = scmp.lt.s32.totalorder %s809_s14, 3 }
   0x9   : > { %p147_p6 = pnand %p588_p3, %p146_p5 }
   0xa   : > { %v196_v0 = vld [vmem:[%s991_s1] sm:$0xff] (!%p147_p6)  ;;  %v197_v1 = vld [vmem:[%s991_s1 + $0x8] sm:$0xff] (!%p147_p6)  ;;  %v198_v2 = vld [vmem:[%s991_s1 + $0x10] sm:$0xff] (!%p147_p6)  ;;  %s902_s27 = sshll.u32 (!%p147_p6), %s876_s15, 2  ;;  %vm207_vm0 = vcmask (!%p147_p6), 261120   ;;  %vm305_vm1 = vcmask (!%p147_p6), 64512  }
   0xb   : > { %150 = sbr.rel (%p147_p6) target bundleno = 613 (0x265), region = 32  ;;  %v639_v3 = vpack.c.bf16 (!%p147_p6), %v197_v1, %v196_v0  ;;  %v199_v4 = vld [vmem:[%s991_s1 + $0x18] sm:$0xff] (!%p147_p6)  ;;  %p178_p7 = scmp.lt.s32.totalorder (!%p147_p6), %s902_s27, 6  ;;  %v592_v10 = vld [vmem:[%s992_s2] ss:$0 sm:$0xff] (!%p147_p6) }
   0xc   : > { %v643_v5 = vpack.c.bf16 (!%p147_p6), %v199_v4, %v198_v2  ;;  %s170_s10 = sand.u32 (!%p147_p6), 1, %s801_s12  }
   0xd   : > { %640 = vmatprep.subr.bf16.mxu0 (!%p147_p6), %v639_v3  ;;  %647 = vmatprep.subr.bf16.mxu1 (!%p147_p6), %v639_v3  ;;  %s589_s11 = sshll.u32 (!%p147_p6), %s170_s10, 5 }
   0xe   : > { %642 = vmatpush3.bf16.msra.mxu0 (!%p147_p6), %v639_v3  ;;  %649 = vmatpush3.bf16.msra.mxu1 (!%p147_p6), %v639_v3  ;;  %s924_s14 = scalar_lea.vmem (!%p147_p6), [#allocation2], %s589_s11  }
   0xf   : > { %644 = vmatprep.subr.bf16.mxu0 (!%p147_p6), %v643_v5  ;;  %648 = vmatprep.subr.bf16.mxu1 (!%p147_p6), %v643_v5 }
  0x12   : > { %s179_s30 = scalar_select %p178_p7, %s902_s27, 6  ;;  %646 = vmatpush3.bf16.msra.mxu0 %v643_v5  ;;  %650 = vmatpush3.bf16.msra.mxu1 %v643_v5 }
  0x13   : > { %s366_s12 = ssub.s32 (%p888_p4), 7, %s902_s27  ;;  %s614_s17 = sshll.u32 (%p888_p4), %s876_s15, 5 }
  0x14   : > { %s591_s4 = sshll.u32 %s179_s30, 3  ;;  %p367_p8 = scmp.lt.s32.totalorder (%p888_p4), %s366_s12, 4 }
  0x15   : > { %s181_s7 = scalar_lea.vmem %s990_s0, %s591_s4  ;;  %s941_s22 = scalar_lea.vmem (%p888_p4), %s993_s3, %s614_s17  }
  0x16   : > { %v192_v6 = vld [vmem:[%s181_s7] sm:$0xff]  ;;  %v194_v7 = vld [vmem:[%s181_s7 + $0x10] sm:$0xff]  ;;  %v193_v8 = vld [vmem:[%s181_s7 + $0x8] sm:$0xff] }
  0x17   : > { %v195_v9 = vld [vmem:[%s181_s7 + $0x18] sm:$0xff]  ;;  %633 = vmatprep.mubr.msk.f32.mxu0 %vm207_vm0, %v192_v6  ;;  %636 = vmatprep.mubr.msk.f32.mxu1 %vm207_vm0, %v194_v7 }
  0x18   : > { %634 = vmatmul.mubr.msk.f32.vlgmr.msra.gmra.mrb[0].mxu0 %vm207_vm0, %v193_v8  ;;  %637 = vmatmul.mubr.msk.f32.vlgmr.msra.gmra.mrb[0].mxu1 %vm207_vm0, %v195_v9 }
  0xeb   : > { %v635_v11 = vpop.f32.mrb[0].mxu0  ;;  %v638_v12 = vpop.f32.mrb[0].mxu1 }
  0xec   : > { %v286_v13 = vpop.f32.mrb[1].mxu0  ;;  %v296_v14 = vpop.f32.mrb[1].mxu1  ;;  %v302_v15 = vadd.f32 %v638_v12, %v592_v10  ;;  %v292_v18 = vadd.f32 %v635_v11, %v592_v10 }
  0xed   : > { %v287_v16 = vadd.f32 %v592_v10, %v286_v13  ;;  %v297_v17 = vadd.f32 %v592_v10, %v296_v14 }
  0xee   : > { %v315_v21 = vsel %vm305_vm1, %v302_v15, -inf  ;;  %v309_v22 = vsel %vm305_vm1, %v292_v18, -inf }
  0xef   : > { %v312_v19 = vsel %vm305_vm1, %v297_v17, -inf  ;;  %v306_v20 = vsel %vm305_vm1, %v287_v16, -inf }
  0xf0   : > { %313 = vmax.xlane.f32.xlu1 %v312_v19  ;;  %307 = vmax.xlane.f32.xlu0 %v306_v20 }
  0xf4   : > { %316 = vmax.xlane.f32.xlu1 %v315_v21  ;;  %310 = vmax.xlane.f32.xlu0 %v309_v22 }
 0x17d   : > { %v314_v23 = vpop.xlane.xlu1 %313  ;;  %v308_v24 = vpop.xlane.xlu0 %307 }
 0x17e   : > { %v320_v25 = vsub.f32 %v297_v17, %v314_v23  ;;  %v318_v26 = vsub.f32 %v287_v16, %v308_v24 }
 0x180   : > { %v322_v27 = vmul.f32 1.442695, %v318_v26  ;;  %v326_v28 = vmul.f32 1.442695, %v320_v25 }
 0x181   : > { %v317_v29 = vpop.xlane.xlu1 %316  ;;  %v311_v30 = vpop.xlane.xlu0 %310 }
 0x182   : > { %v321_v31 = vsub.f32 %v302_v15, %v317_v29  ;;  %v319_v32 = vsub.f32 %v292_v18, %v311_v30  ;;  %739 = vpow2.f32 %v322_v27 }
 0x183   : > { %741 = vpow2.f32 %v326_v28 }
 0x184   : > { %v324_v33 = vmul.f32 1.442695, %v319_v32  ;;  %v328_v34 = vmul.f32 1.442695, %v321_v31 }
 0x186   : > { %743 = vpow2.f32 %v324_v33 }
 0x187   : > { %745 = vpow2.f32 %v328_v34 }
 0x18c   : > { %v740_v35 = vpop.eup %739 }
 0x18d   : > { %v330_v36 = vsel %vm305_vm1, %v740_v35, 0.0  ;;  %v742_v37 = vpop.eup %741 }
 0x18e   : > { %331 = vadd.xlane.f32.xlu0 %v330_v36  ;;  %v336_v39 = vsel %vm305_vm1, %v742_v37, 0.0 }
 0x190   : > { %v744_v38 = vpop.eup %743 }
 0x191   : > { %v333_v40 = vsel %vm305_vm1, %v744_v38, 0.0  ;;  %v746_v41 = vpop.eup %745 }
 0x192   : > { %337 = vadd.xlane.f32.xlu0 %v336_v39  ;;  %334 = vadd.xlane.f32.xlu1 %v333_v40  ;;  %v339_v42 = vsel %vm305_vm1, %v746_v41, 0.0 }
 0x196   : > { %340 = vadd.xlane.f32.xlu1 %v339_v42 }
 0x21b   : > { %v332_v43 = vpop.xlane.xlu0 %331 }
 0x21c   : > { %747 = vlog2.f32 %v332_v43 }
 0x21f   : > { %v335_v44 = vpop.xlane.xlu1 %334  ;;  %v338_v45 = vpop.xlane.xlu0 %337 }
 0x220   : > { %749 = vlog2.f32 %v335_v44 }
 0x221   : > { %751 = vlog2.f32 %v338_v45 }
 0x223   : > { %v341_v46 = vpop.xlane.xlu1 %340 }
 0x224   : > { %753 = vlog2.f32 %v341_v46 }
 0x226   : > { %v748_v47 = vpop.eup %747 }
 0x227   : > { %v343_v48 = vmul.f32 0.6931472, %v748_v47 }
 0x229   : > { %v350_v49 = vsub.f32 %v318_v26, %v343_v48 }
 0x22a   : > { %v750_v50 = vpop.eup %749 }
 0x22b   : > { %v752_v51 = vpop.eup %751  ;;  %354 = vst.msk [vmem:[%s924_s14] sm:$0xff] %vm305_vm1, %v350_v49  ;;  %v345_v52 = vmul.f32 0.6931472, %v750_v50 }
 0x22c   : > { %v347_v53 = vmul.f32 0.6931472, %v752_v51 }
 0x22d   : > { %v351_v54 = vsub.f32 %v319_v32, %v345_v52  ;;  %364 = sbr.rel (!%p888_p4) target bundleno = 613 (0x265), region = 36 }
 0x22e   : > { %v754_v55 = vpop.eup %753  ;;  %v352_v56 = vsub.f32 %v320_v25, %v347_v53 }
 0x22f   : > { %355 = vst.msk [vmem:[%s924_s14 + $0x8] sm:$0xff] %vm305_vm1, %v351_v54  ;;  %v349_v57 = vmul.f32 0.6931472, %v754_v55 }
 0x230   : > { %356 = vst.msk [vmem:[%s924_s14 + $0x10] sm:$0xff] %vm305_vm1, %v352_v56 }
 0x231   : > { %v353_v58 = vsub.f32 %v321_v31, %v349_v57 }
 0x233   : > { %357 = vst.msk [vmem:[%s924_s14 + $0x18] sm:$0xff] %vm305_vm1, %v353_v58 }
 0x234   : > { %s1002_s12 = smov (!%p367_p8, %s366_s12), 4 }
 0x235   : > { %s599_s23 = sshll.u32 %s1002_s12, 7 }
 0x236   : > { %p602_p9 = scmp.eq.s32.totalorder %s599_s23, 0 }
 0x237   : > { %s947_s24 = sshrl.u32 (!%p602_p9), %s1002_s12, 2 }
 0x238   : > { %375 = sbr.rel (%p602_p9) target bundleno = 613 (0x265), region = 40  ;;  %p603_p10 = scmp.le.s32.totalorder (!%p602_p9), %s947_s24, 0 }
 0x23f   : > { %541 = sbr.rel (%p603_p10) target bundleno = 592 (0x250), region = 116  ;;  %s995_s15 = smov (!%p603_p10), %s941_s22 }
 0x240   : > { %s996_s20 = smov (!%p603_p10), %s924_s14  ;;  %s956_s25 = smov (!%p603_p10), 0  }
 0x241   : > { %s823_s26 = smov (!%p603_p10), 0  }
 0x246 LB: >> { %v443_v59 = vld [vmem:[%s817_s20] sm:$0xff]  ;;  %v445_v60 = vld [vmem:[%s817_s20 + $0x8] sm:$0xff]  ;;  %v447_v61 = vld [vmem:[%s817_s20 + $0x10] sm:$0xff]  ;;  %s451_s27 = sadd.s32 1, %s821_s25  ;;  %s437_s26 = sadd.s32 1, %s825_s26   ;;  %s825_s26 = sphi %s823_s26, %s437_s26   ;;  %s821_s25 = sphi %s956_s25, %s997_s25   ;;  %s817_s20 = sphi %s996_s20, %s456_s20   ;;  %s813_s15 = sphi %s995_s15, %s457_s15  }
 0x247   : >> { %444 = vst [vmem:[%s813_s15] sm:$0xff] %v443_v59  ;;  %446 = vst [vmem:[%s813_s15 + $0x8] sm:$0xff] %v445_v60  ;;  %v449_v62 = vld [vmem:[%s817_s20 + $0x18] sm:$0xff]  ;;  %p452_p11 = scmp.ge.s32.totalorder %s451_s27, %s947_s24  ;;  %p436_p12 = scmp.ge.s32.totalorder %s437_s26, %s947_s24 }
 0x248   : >> { %448 = vst [vmem:[%s813_s15 + $0x10] sm:$0xff] %v447_v61  ;;  %450 = vst [vmem:[%s813_s15 + $0x18] sm:$0xff] %v449_v62 }
 0x249   : >> { %s1004_s27 = smov (%p452_p11, %s451_s27), 0  ;;  %439 = sbr.rel (!%p436_p12) target bundleno = 582 (0x246), region = 122 }
 0x24a   : >> { %s604_s28 = sshll.u32 %s1004_s27, 5  ;;  %s997_s25 = smov %s1004_s27 }
 0x24b   : >> { %s456_s20 = scalar_lea.vmem %s924_s14, %s604_s28 [#allocation2]   ;;  %s457_s15 = scalar_lea.vmem %s941_s22, %s604_s28  }
 0x250 PF: > { %s972_s29 = sand.u32 3, %s1002_s12   ;;  %s615_s30 = sshll.u32 %s947_s24, 5 }
 0x251   : > { %s462_s4 = scalar_lea.vmem %s924_s14, %s615_s30 [#allocation2]   ;;  %s464_s5 = scalar_lea.vmem %s941_s22, %s615_s30  }
 0x252   : > { %p609_p13 = scmp.le.s32.totalorder %s972_s29, 0 }
 0x253   : > { %s827_s6 = smov (!%p609_p13), %s464_s5   ;;  %s831_s7 = smov (!%p609_p13), %s462_s4  }
 0x254   : > { %555 = sbr.rel (%p609_p13) target bundleno = 613 (0x265), region = 127  ;;  %s835_s8 = smov (!%p609_p13), 0  }
 0x255   : > { %s839_s9 = smov (!%p609_p13), 0  }
 0x25b LB: >> { %v474_v63 = vld [vmem:[%s833_s7] sm:$0xff]  ;;  %s476_s10 = sadd.s32 1, %s837_s8  ;;  %s468_s9 = sadd.s32 1, %s841_s9   ;;  %s841_s9 = sphi %s839_s9, %s468_s9   ;;  %s837_s8 = sphi %s835_s8, %s836_s8   ;;  %s833_s7 = sphi %s831_s7, %s481_s7   ;;  %s829_s6 = sphi %s827_s6, %s482_s6  }
 0x25c   : >> { %475 = vst [vmem:[%s829_s6] sm:$0xff] %v474_v63  ;;  %p477_p0 = scmp.ge.s32.totalorder %s476_s10, %s972_s29  ;;  %p467_p1 = scmp.ge.s32.totalorder %s468_s9, %s972_s29 }
 0x25e   : >> { %s1006_s10 = smov (%p477_p0, %s476_s10), 0  ;;  %470 = sbr.rel (!%p467_p1) target bundleno = 603 (0x25b), region = 133 }
 0x25f   : >> { %s610_s11 = sshll.u32 %s1006_s10, 3  ;;  %s836_s8 = smov %s1006_s10  }
 0x260   : >> { %s481_s7 = scalar_lea.vmem %s462_s4, %s610_s11 [#allocation2]   ;;  %s482_s6 = scalar_lea.vmem %s464_s5, %s610_s11  }
 0x265 PF: > { %p10_p2 = scmp.ge.s32.totalorder %s878_s16, 4   ;;  %s998_s12 = smov %s805_s13 }
 0x266   : > { %s999_s13 = smov %s886_s19  ;;  %s1000_s14 = smov %s878_s16 }
 0x267   :  { %12 = sbr.rel (!%p10_p2) target bundleno = 2 (0x2), region = 144 }

</bundles_post_ra>
